<compile_context>
chip_gen: v7x
topology: tpu7x:2x2x1
jax: 0.10.0
libtpu: 0.0.40
codegen_flags: <defaults>
</compile_context>

<pallas_src>
import jax
import jax.numpy as jnp
from jax.experimental import pallas as pl
from jax.experimental.pallas import tpu as pltpu

EPS = 1e-5


# ---------------------------------------------------------------------------
# Kernels
# ---------------------------------------------------------------------------
def _stats_kernel(x_ref, sum_ref, sumsq_ref):
    """Accumulate per-channel sum and sum-of-squares over (N, HW) tiles.

    x_ref:   [tc, thw]  (N dim squeezed away by the BlockSpec)
    sum_ref, sumsq_ref: [tc, 1] resident accumulators (same block across n/hw).
    """
    first_step = (pl.program_id(1) == 0) & (pl.program_id(2) == 0)

    @pl.when(first_step)
    def _():
        sum_ref[...] = jnp.zeros_like(sum_ref)
        sumsq_ref[...] = jnp.zeros_like(sumsq_ref)

    x = x_ref[...]
    sum_ref[...] += jnp.sum(x, axis=1, keepdims=True)
    sumsq_ref[...] += jnp.sum(x * x, axis=1, keepdims=True)


def _normalize_relu_kernel(x_ref, scale_ref, bias_ref, o_ref):
    """y = max(x * scale + bias, 0) with per-channel scale/bias broadcast over lanes."""
    o_ref[...] = jnp.maximum(x_ref[...] * scale_ref[...] + bias_ref[...], 0.0)


# ---------------------------------------------------------------------------
# Tile selection
# ---------------------------------------------------------------------------
def _pick_tiles(c, hw, budget_elems=1 << 19):
    """Pick (tc, thw) tiles: thw on lanes, tc on sublanes, ~<= 2 MiB f32 per block."""
    # Lane tile over H*W: prefer the full spatial extent (always layout-legal);
    # if too large even with an 8-row channel tile, use a multiple-of-128 divisor.
    thw = hw
    if hw * 8 > budget_elems:
        t = max(128, ((budget_elems // 8) // 128) * 128)
        while t >= 128:
            if hw % t == 0:
                thw = t
                break
            t -= 128

    # Channel (sublane) tile: largest multiple-of-8 divisor of C (or C itself)
    # whose block fits the per-block budget.
    cands = [c] + [t for t in range(8, c + 1, 8) if c % t == 0]
    fitting = [t for t in cands if t * thw <= budget_elems]
    tc = max(fitting) if fitting else min(cands)
    return tc, thw


# ---------------------------------------------------------------------------
# Wrapper
# ---------------------------------------------------------------------------
def batchnorm_relu_nchw(x_nchw, gamma, beta):
    """x_nchw: [N, C, H, W]; gamma/beta: [C] -> BatchNorm2d(training stats)+ReLU."""
    n, c, h, w = x_nchw.shape
    hw = h * w
    x3d = x_nchw.reshape(n, c, hw).astype(jnp.float32)  # native layout, free reshape

    tc, thw = _pick_tiles(c, hw)
    grid = (c // tc, n, hw // thw)

    x_spec = pl.BlockSpec((None, tc, thw), lambda ci, ni, hi: (ni, ci, hi))
    cvec_spec = pl.BlockSpec((tc, 1), lambda ci, ni, hi: (ci, 0))

    # ---- Phase 1: per-channel sum / sum-of-squares (single pass over x) ----
    sum_c, sumsq_c = pl.pallas_call(
        _stats_kernel,
        out_shape=(
            jax.ShapeDtypeStruct((c, 1), jnp.float32),
            jax.ShapeDtypeStruct((c, 1), jnp.float32),
        ),
        grid=grid,
        in_specs=[x_spec],
        out_specs=(cvec_spec, cvec_spec),
        compiler_params=pltpu.CompilerParams(
            dimension_semantics=("parallel", "arbitrary", "arbitrary")
        ),
    )(x3d)

    # ---- Phase boundary: tiny [C]-sized math, done once ----
    cnt = jnp.float32(n * hw)
    mean = sum_c / cnt                                        # [C, 1]
    var = jnp.maximum(sumsq_c / cnt - mean * mean, 0.0)       # biased variance
    inv_std = 1.0 / jnp.sqrt(var + EPS)
    g = gamma.reshape(c, 1).astype(jnp.float32)
    b = beta.reshape(c, 1).astype(jnp.float32)
    scale = g * inv_std                                       # [C, 1]
    bias = b - mean * scale                                   # [C, 1]

    # ---- Phase 2: normalize + affine + ReLU (one read + one write of x) ----
    out3d = pl.pallas_call(
        _normalize_relu_kernel,
        out_shape=jax.ShapeDtypeStruct((n, c, hw), jnp.float32),
        grid=grid,
        in_specs=[x_spec, cvec_spec, cvec_spec],
        out_specs=x_spec,
        compiler_params=pltpu.CompilerParams(
            dimension_semantics=("parallel", "parallel", "parallel")
        ),
    )(x3d, scale, bias)

    return out3d.reshape(n, c, h, w).astype(x_nchw.dtype)


# ---------------------------------------------------------------------------
# Reference
# ---------------------------------------------------------------------------
def _reference(x_nchw, gamma, beta):
    mean = jnp.mean(x_nchw, axis=(0, 2, 3), keepdims=True)
    var = jnp.mean((x_nchw - mean) ** 2, axis=(0, 2, 3), keepdims=True)
    y = (x_nchw - mean) / jnp.sqrt(var + EPS)
    y = y * gamma.reshape(1, -1, 1, 1) + beta.reshape(1, -1, 1, 1)
    return jnp.maximum(y, 0.0)


if __name__ == "__main__":
    key = jax.random.PRNGKey(0)
    kx, kg, kb, kx2, kg2, kb2 = jax.random.split(key, 6)

    # Small smoke-test shape (tc == C fallback path, single HW tile).
    N, C, H, W = 2, 4, 16, 16
    x = jax.random.normal(kx, (N, C, H, W), dtype=jnp.float32)
    gamma = 1.0 + 0.1 * jax.random.normal(kg, (C,), dtype=jnp.float32)
    beta = 0.1 * jax.random.normal(kb, (C,), dtype=jnp.float32)

    out = jax.block_until_ready(batchnorm_relu_nchw(x, gamma, beta))
    ref = _reference(x, gamma, beta)
    assert out.shape == (N, C, H, W)
    assert jnp.allclose(out, ref, atol=1e-4, rtol=1e-4), "mismatch vs reference (small)"

    # The module's actual shape [1, 224, 56, 56] (exercises the tiled channel path).
    N2, C2, H2, W2 = 1, 224, 56, 56
    x2 = jax.random.normal(kx2, (N2, C2, H2, W2), dtype=jnp.float32)
    gamma2 = 1.0 + 0.1 * jax.random.normal(kg2, (C2,), dtype=jnp.float32)
    beta2 = 0.1 * jax.random.normal(kb2, (C2,), dtype=jnp.float32)

    out2 = jax.block_until_ready(batchnorm_relu_nchw(x2, gamma2, beta2))
    ref2 = _reference(x2, gamma2, beta2)
    assert out2.shape == (N2, C2, H2, W2)
    assert jnp.allclose(out2, ref2, atol=1e-4, rtol=1e-4), "mismatch vs reference (full)"

    print("KERNEL_OK")
</pallas_src>

<mosaic_0001>
module attributes {stable_mosaic.version = 11 : i64} {
  func.func @_stats_kernel(%arg0: i32, %arg1: i32, %arg2: i32, %arg3: memref<1x4x256xf32, #tpu.memory_space<vmem>>, %arg4: memref<4x1xf32, #tpu.memory_space<vmem>>, %arg5: memref<4x1xf32, #tpu.memory_space<vmem>>) attributes {dimension_semantics = [#tpu.dimension_semantics<parallel>, #tpu.dimension_semantics<arbitrary>, #tpu.dimension_semantics<arbitrary>], iteration_bounds = array<i64: 1, 2, 1>, scalar_prefetch = 0 : i64, scratch_operands = 0 : i64, tpu.core_type = #tpu.core_type<tc>, window_params = [{transform_indices = @transform_0, window_bounds = array<i64: 1, 4, 256>}, {transform_indices = @transform_1, window_bounds = array<i64: 4, 1>}, {transform_indices = @transform_2, window_bounds = array<i64: 4, 1>}]} {
    %c0_i32 = arith.constant 0 : i32
    %0 = arith.cmpi eq, %arg1, %c0_i32 : i32
    %c0_i32_0 = arith.constant 0 : i32
    %1 = arith.cmpi eq, %arg2, %c0_i32_0 : i32
    %2 = arith.andi %0, %1 : i1
    %3 = arith.extui %2 : i1 to i32
    %c0_i32_1 = arith.constant 0 : i32
    %4 = arith.cmpi ne, %3, %c0_i32_1 : i32
    scf.if %4 {
      %cst_13 = arith.constant 0.000000e+00 : f32
      %18 = vector.broadcast %cst_13 : f32 to vector<4x1xf32>
      %c0_14 = arith.constant 0 : index
      %c0_15 = arith.constant 0 : index
      %19 = vector.load %arg4[%c0_14, %c0_15] : memref<4x1xf32, #tpu.memory_space<vmem>>, vector<4x1xf32>
      tpu.vector_store %arg4[%c0_14, %c0_15], %18 {strides = array<i32>} : memref<4x1xf32, #tpu.memory_space<vmem>>, vector<4x1xf32>,
      %cst_16 = arith.constant 0.000000e+00 : f32
      %20 = vector.broadcast %cst_16 : f32 to vector<4x1xf32>
      %c0_17 = arith.constant 0 : index
      %c0_18 = arith.constant 0 : index
      %21 = vector.load %arg5[%c0_17, %c0_18] : memref<4x1xf32, #tpu.memory_space<vmem>>, vector<4x1xf32>
      tpu.vector_store %arg5[%c0_17, %c0_18], %20 {strides = array<i32>} : memref<4x1xf32, #tpu.memory_space<vmem>>, vector<4x1xf32>,
    } else {
    }
    %c0 = arith.constant 0 : index
    %c0_2 = arith.constant 0 : index
    %c0_3 = arith.constant 0 : index
    %5 = vector.load %arg3[%c0, %c0_2, %c0_3] : memref<1x4x256xf32, #tpu.memory_space<vmem>>, vector<1x4x256xf32>
    %6 = vector.shape_cast %5 : vector<1x4x256xf32> to vector<4x256xf32>
    %c0_4 = arith.constant 0 : index
    %c0_5 = arith.constant 0 : index
    %7 = vector.load %arg4[%c0_4, %c0_5] : memref<4x1xf32, #tpu.memory_space<vmem>>, vector<4x1xf32>
    %cst = arith.constant dense<0.000000e+00> : vector<4xf32>
    %8 = vector.multi_reduction <add>, %6, %cst [1] : vector<4x256xf32> to vector<4xf32>
    %9 = vector.shape_cast %8 : vector<4xf32> to vector<4x1xf32>
    %10 = arith.addf %7, %9 : vector<4x1xf32>
    %c0_6 = arith.constant 0 : index
    %c0_7 = arith.constant 0 : index
    %11 = vector.load %arg4[%c0_6, %c0_7] : memref<4x1xf32, #tpu.memory_space<vmem>>, vector<4x1xf32>
    tpu.vector_store %arg4[%c0_6, %c0_7], %10 {strides = array<i32>} : memref<4x1xf32, #tpu.memory_space<vmem>>, vector<4x1xf32>,
    %c0_8 = arith.constant 0 : index
    %c0_9 = arith.constant 0 : index
    %12 = vector.load %arg5[%c0_8, %c0_9] : memref<4x1xf32, #tpu.memory_space<vmem>>, vector<4x1xf32>
    %13 = arith.mulf %6, %6 : vector<4x256xf32>
    %cst_10 = arith.constant dense<0.000000e+00> : vector<4xf32>
    %14 = vector.multi_reduction <add>, %13, %cst_10 [1] : vector<4x256xf32> to vector<4xf32>
    %15 = vector.shape_cast %14 : vector<4xf32> to vector<4x1xf32>
    %16 = arith.addf %12, %15 : vector<4x1xf32>
    %c0_11 = arith.constant 0 : index
    %c0_12 = arith.constant 0 : index
    %17 = vector.load %arg5[%c0_11, %c0_12] : memref<4x1xf32, #tpu.memory_space<vmem>>, vector<4x1xf32>
    tpu.vector_store %arg5[%c0_11, %c0_12], %16 {strides = array<i32>} : memref<4x1xf32, #tpu.memory_space<vmem>>, vector<4x1xf32>,
    return
  }
  func.func @transform_0(%arg0: i32, %arg1: i32, %arg2: i32) -> (i32, i32, i32) {
    %c0_i32 = arith.constant 0 : i32
    return %arg1, %arg0, %arg2 : i32, i32, i32
  }
  func.func @transform_1(%arg0: i32, %arg1: i32, %arg2: i32) -> (i32, i32) {
    %c0_i32 = arith.constant 0 : i32
    %c0_i32_0 = arith.constant 0 : i32
    return %arg0, %c0_i32 : i32, i32
  }
  func.func @transform_2(%arg0: i32, %arg1: i32, %arg2: i32) -> (i32, i32) {
    %c0_i32 = arith.constant 0 : i32
    %c0_i32_0 = arith.constant 0 : i32
    return %arg0, %c0_i32 : i32, i32
  }
}

</mosaic_0001>

<bundles_post_ra>
// kernel: tpu_custom_call.1
= control target key start
LH: loop header
LB: loop body
LE: loop exit
PB: predicated region body
PF: predicated region fallthrough
CT: control target
= control target key end

     0   :  { %8 = vsyncpa [#allocation3], 0  ;;  %s650_s0 = inlined_call_operand.hbm [shape: f32[2,4,256], index: 0, kind: input, shape index: {}]   ;;  %s651_s1 = inlined_call_operand.vmem [shape: f32[4,1], index: 1, kind: output, shape index: {0}]   ;;  %s652_s2 = inlined_call_operand.vmem [shape: f32[4,1], index: 2, kind: output, shape index: {1}]  }
   0x1   :  { %10 = vsyncpa [#allocation3 + $0x1], 0  ;;  %s511_s9 = smov 0   ;;  %s513_s10 = smov 0  }
   0x2   :  { %s515_s11 = smov 0   ;;  %s517_s12 = smov 0  }
   0x3   :  { %s519_s13 = smov 0   ;;  %s521_s14 = smov 0  }
   0x4 LB: > { %s340_s15 = sadd.s32 4294967295, %s492_s14   ;;  %s31_s16 = sadd.s32 1, %s488_s13  ;;  %s492_s14 = sphi %s521_s14, %s16_s14   ;;  %s488_s13 = sphi %s519_s13, %s662_s13   ;;  %s484_s12 = sphi %s517_s12, %s661_s12   ;;  %s480_s11 = sphi %s515_s11, %s660_s11   ;;  %s476_s10 = sphi %s513_s10, %s659_s10   ;;  %s472_s9 = sphi %s511_s9, %s658_s9  }
   0x5   : > { %p33_p0 = scmp.ge.s32.totalorder %s31_s16, 2  ;;  %s46_s17 = sadd.s32 1, %s480_s11 }
   0x6   : > { %p53_p1 = scmp.ne.s32.totalorder %s480_s11, %s476_s10  ;;  %p54_p2 = scmp.eq.s32.totalorder %s492_s14, 0 }
   0x7   : > { %s664_s16 = smov (%p33_p0, %s31_s16), 0  ;;  %p59_p4 = scmp.ne.s32.totalorder %s476_s10, %s472_s9 }
   0x8   : > { %p547_p3 = por %p54_p2, %p53_p1  ;;  %s39_s19 = ssub.s32 %s488_s13, %s664_s16 }
   0x9   : > { %p60_p5 = scmp.eq.s32.totalorder %s340_s15, 0  ;;  %p44_p6 = scmp.eq.s32.totalorder %s39_s19, 0 }
   0xa   : > { %p361_p8 = scmp.lt.s32.totalorder %s492_s14, 2  ;;  %s135_s22 = sand.u32 1, %s480_s11  }
   0xb   : > { %p554_p7 = por %p60_p5, %p59_p4  ;;  %s353_s23 = sshll.u32 %s488_s13, 7 }
   0xc   : > { %s560_s21 = scalar_select %p44_p6, %s480_s11, %s46_s17  }
   0xd   : > { %s343_s24 = sshll.u32 %s135_s22, 3  ;;  %s567_s27 = scalar_lea.hbm %s650_s0, %s353_s23 }
   0xe   : > { %s139_s28 = scalar_lea.vmem [#allocation2], %s343_s24  ;;  %p571_p9 = pnand %p361_p8, %p547_p3 }
   0xf   : > { %s151_s29 = sshll.u32 %s139_s28, 4  ;;  %s136_s3 = scalar_lea.sflag [#allocation3], %s135_s22  ;;  %s575_s29 = int_to_ptr.vmem [resolvable:$true] %s151_s29 }
  0x10   : > { %s412_s4 = scalar_lea.hbm %s567_s27, 128  ;;  %p414_p13 = pneg %p571_p9 }
  0x11   : > { %p413_p12 = scmp.ne.s32.totalorder %s567_s27, %s412_s4  ;;  %s417_s7 = scalar_lea.hbm %s650_s0, 256 }
  0x12   : > { %p418_p2 = scmp.lt.u32.totalorder %s567_s27, %s650_s0  ;;  %p419_p3 = scmp.lt.u32.totalorder %s417_s7, %s412_s4 }
  0x13   : > { %p415_p0 = pnand %p414_p13, %p413_p12  ;;  %p421_p5 = scmp.lt.u32.totalorder %s412_s4, %s567_s27 }
  0x14   : > { %p420_p4 = por %p419_p3, %p418_p2 }
  0x15   : > { %p416_p1 = pneg %p415_p0 }
  0x16   : > { %p422_p6 = por %p421_p5, %p420_p4 }
  0x18   : > { %p423_p8 = pnand %p422_p6, %p416_p1 }
  0x1a   : > { %426 = shalt.err (!%p423_p8)
}
  0x1b   : > { %s427_s15 = scalar_lea.vmem %s575_s29, 128  ;;  %s494_s17 = smov [#allocation2]  }
  0x1c   : > { %p428_p12 = scmp.ne.s32.totalorder %s575_s29, %s427_s15  ;;  %s432_s18 = sshll.u32 %s494_s17, 4  ;;  %s433_s18 = int_to_ptr.vmem [resolvable:$false] %s432_s18 }
  0x1d   : > { %s434_s19 = scalar_lea.vmem %s433_s18, 256  ;;  %p435_p11 = scmp.lt.s32.totalorder %s575_s29, %s433_s18 }
  0x1e   : > { %p430_p0 = pnand %p428_p12, %p414_p13  ;;  %p436_p2 = scmp.lt.s32.totalorder %s434_s19, %s427_s15 }
  0x20   : > { %p431_p10 = pneg %p430_p0  ;;  %p437_p3 = por %p436_p2, %p435_p11 }
  0x22   : > { %p438_p4 = pnand %p437_p3, %p431_p10 }
  0x24   : > { %441 = shalt.err (!%p438_p4)
}
  0x25   : > { %360 = dma.hbm_to_vmem [thread:$0]  (!%p571_p9), %s567_s27, 128, %s575_s29, %s136_s3  }
  0x26   : > { %p656_p1 = scmp.lt.s32.totalorder %s492_s14, 3  ;;  %p657_p5 = scmp.ge.s32.totalorder %s492_s14, 1 }
  0x28   : > { %p157_p13 = pnand %p657_p5, %p656_p1 }
  0x29   : > { %s162_s22 = sand.u32 (!%p157_p13), 1, %s476_s10  }
  0x2a   : > { %160 = sbr.rel (%p157_p13) target bundleno = 214 (0xd6), region = 24  ;;  %s347_s23 = sshll.u32 (!%p157_p13), %s162_s22, 3 }
  0x2b   : > { %s163_s24 = scalar_lea.sflag (!%p157_p13), [#allocation3], %s162_s22  ;;  %s166_s25 = scalar_lea.vmem (!%p157_p13), [#allocation2], %s347_s23 }
  0x31   : > { %467 = dma.done.wait (%p554_p7), %s163_s24, 128  }
  0x32   : > { %469 = vsyncadd (%p554_p7), %s163_s24, 4294967168  ;;  %p199_p10 = scmp.eq.s32.totalorder %s484_s12, 0 }
  0x33   : > { %vm205_vm0 = vcmask (%p199_p10), 3072   ;;  %v495_v0 = vmov (%p199_p10), 0.0  }
  0x34   : > { %204 = sbr.rel (!%p199_p10) target bundleno = 59 (0x3b), region = 32  ;;  %206 = vst.msk [vmem:[%s651_s1] sm:$0xf] (%p199_p10), %vm205_vm0, %v495_v0  ;;  %207 = vst.msk [vmem:[%s652_s2] sm:$0xf] (%p199_p10), %vm205_vm0, %v495_v0 }
  0x3b PF: > { %v208_v1 = vld [vmem:[%s166_s25] sm:$0xff]  ;;  %vm213_vm1 = vcmask 1043456   ;;  %vm220_vm2 = vcmask 3072  }
  0x3c   : > { %v211_v2 = vcombine.high %v208_v1, %v208_v1  ;;  %v214_v3 = vsel %vm213_vm1, %v208_v1, 0.0  ;;  %v223_v4 = vmul.f32 %v208_v1, %v208_v1  ;;  %v209_v11 = vld [vmem:[%s651_s1] sm:$0xf] }
  0x3d   : > { %v222_v14 = vld [vmem:[%s652_s2] sm:$0xf] }
  0x3e   : > { %v215_v5 = vsel %vm213_vm1, %v211_v2, 0.0  ;;  %v225_v6 = vcombine.high %v223_v4, %v223_v4  ;;  %v227_v7 = vsel %vm213_vm1, %v223_v4, 0.0 }
  0x3f   : > { %v216_v8 = vadd.f32 %v215_v5, %v214_v3 }
  0x40   : > { %v228_v9 = vsel %vm213_vm1, %v225_v6, 0.0 }
  0x41   : > { %217 = vadd.xlane.f32.xlu0 %v216_v8  ;;  %v229_v10 = vadd.f32 %v228_v9, %v227_v7 }
  0x45   : > { %230 = vadd.xlane.f32.xlu0 %v229_v10 }
  0xce   : > { %v218_v12 = vpop.xlane.xlu0 %217 }
  0xcf   : > { %v219_v13 = vadd.f32 %v218_v12, %v209_v11 }
  0xd1   : > { %221 = vst.msk [vmem:[%s651_s1] sm:$0xf] %vm220_vm2, %v219_v13 }
  0xd2   : > { %v231_v15 = vpop.xlane.xlu0 %230 }
  0xd3   : > { %v232_v16 = vadd.f32 %v231_v15, %v222_v14 }
  0xd5   : > { %233 = vst.msk [vmem:[%s652_s2] sm:$0xf] %vm220_vm2, %v232_v16 }
  0xd6 PF: > { %s16_s14 = sadd.s32 1, %s492_s14   ;;  %s658_s9 = smov %s476_s10 }
  0xd7   : > { %p13_p7 = scmp.ge.s32.totalorder %s16_s14, 4   ;;  %s659_s10 = smov %s480_s11 }
  0xd8   : > { %s660_s11 = smov %s560_s21  ;;  %s661_s12 = smov %s488_s13 }
  0xd9   : > { %s662_s13 = smov %s664_s16  ;;  %15 = sbr.rel (!%p13_p7) target bundleno = 4 (0x4), region = 80 }
  0xe0   :  { %267 = vsyncpa [#allocation3], 1 }
  0xe1   :  { %269 = vsyncpa [#allocation3 + $0x1], 1 }

</bundles_post_ra>
